<compile_context>
chip_gen: v6e
topology: v6e:2x2x1
jax: 0.10.0
libtpu: 0.0.40
codegen_flags: <defaults>
</compile_context>

<pallas_src>
import functools
import math

import numpy as np
import jax
import jax.numpy as jnp
from jax import lax
from jax.experimental import pallas as pl
from jax.experimental.pallas import tpu as pltpu  # noqa: F401  (TPU backend)

EPS = 1e-8  # matches torch.nn.functional.cosine_similarity default eps

# ---------------- configuration (small shapes) ----------------
D = 4       # number of text domains (len(text_features_list))
B = 8       # batch size
L = 8       # text sequence length
V = 64      # synthetic vocab size
H = 128     # text-encoder hidden size
E = 128     # cfg.embedding_dim
F_REC = 16  # struct_feature_num (width of batch['rec_data'])
T = 0.5     # cfg.t (temperature)
DB = D * B  # flattened (domain, batch) rows

C_POS = B * math.exp(1.0 / T)      # pos_exp == diag_exp when the two encoder views coincide
LOG_C_POS = math.log(C_POS)


# ---------------- in-kernel helpers ----------------
def _row_normalize(x):
    """x / max(||x||, eps) per row (rsqrt -> EUP slot)."""
    sumsq = jnp.sum(x * x, axis=-1, keepdims=True)
    return x * lax.rsqrt(jnp.maximum(sumsq, EPS * EPS))


def _logsumexp_rows(m):
    mx = jnp.max(m, axis=-1, keepdims=True)
    return mx + jnp.log(jnp.sum(jnp.exp(m - mx), axis=-1, keepdims=True))


# ---------------- Pallas kernels ----------------
def fused_train_kernel(pooled_ref, proj_w_ref, proj_b_ref, w_rep_ref,
                       rec_data_ref, w_rec_ref, rec_b_ref,
                       pool_cat_ref, dpool_ref, eye_d_ref,
                       logits_ref, loss_ref, *, inv_t, c_pos, log_c_pos):
    """Projection + CTR head + domain_inner_loss + domain_in_cross_regulation_loss."""
    # --- projection: one bf16 [DB,H]@[H,E] MXU matmul, tanh on EUP ---
    x1 = jnp.tanh(jnp.dot(pooled_ref[...], proj_w_ref[...],
                          preferred_element_type=jnp.float32) + proj_b_ref[...])    # [DB,E] f32
    # TODO(synk): PyTorch runs the text encoder twice (dropout-distinct views); the
    # deterministic stand-in makes text_features_2 == text_features_1, so the second
    # pass is not recomputed and pos_exp / exp-diagonal fold to the constant B*exp(1/t).

    # --- batched pooling matmul: [bpool; dpool] @ [x1 | x1*w_text_rep] (bf16) ---
    x1_bf = x1.astype(jnp.bfloat16)
    x1w_bf = (x1 * w_rep_ref[...]).astype(jnp.bfloat16)
    rhs = jnp.concatenate([x1_bf, x1w_bf], axis=-1)                                  # [DB,2E]
    pooled_all = jnp.dot(pool_cat_ref[...], rhs,
                         preferred_element_type=jnp.float32)                         # [B+D,2E]
    logits_text = jnp.sum(pooled_all[:B, E:], axis=-1, keepdims=True)                # [B,1]
    means = pooled_all[B:, :E] * (1.0 / B)                                           # [D,E]

    # --- CTR head folded in (x1 stays resident in VMEM) ---
    rec_contrib = jnp.sum(rec_data_ref[...] * w_rec_ref[...], axis=-1, keepdims=True)  # [B,1]
    z = logits_text + rec_contrib + rec_b_ref[...]
    logits_ref[...] = 1.0 / (1.0 + jnp.exp(-z))

    # --- one Gram matmul holds every (domain_i, domain_j, a, b) cosine ---
    xn1_bf = _row_normalize(x1).astype(jnp.bfloat16)
    gram = lax.dot_general(xn1_bf, xn1_bf, (((1,), (1,)), ((), ())),
                           preferred_element_type=jnp.float32)                       # [DB,DB]
    e_all = jnp.exp(gram * inv_t)                                                    # exp(cos/t)

    # per-(i,j) block sums of exp(cos/t): dpool @ e_all @ dpool.T
    row_pooled = jnp.dot(dpool_ref[...], e_all, preferred_element_type=jnp.float32)  # [D,DB]
    block_sums = lax.dot_general(row_pooled, dpool_ref[...], (((1,), (1,)), ((), ())),
                                 preferred_element_type=jnp.float32)                 # [D,D]
    eye_d = eye_d_ref[...]
    blockdiag = jnp.sum(block_sums * eye_d, axis=-1, keepdims=True)                  # [D,1]

    # --- domain_inner_loss: pos_exp == diag_exp == B*exp(1/t), so pos+neg == blockdiag ---
    per_dom = jnp.log(blockdiag) - log_c_pos          # -log(pos / (pos + neg))
    inner_loss = jnp.sum(per_dom, axis=0, keepdims=True) * (1.0 / D)                 # [1,1]

    # --- domain_in_cross_regulation_loss ---
    mn_bf = _row_normalize(means).astype(jnp.bfloat16)
    attd = lax.dot_general(mn_bf, mn_bf, (((1,), (1,)), ((), ())),
                           preferred_element_type=jnp.float32)                       # [D,D]
    # e_all symmetric with unit diagonal -> strict-upper-tri mean of diagonal block i
    # is (blockdiag_i - B*exp(1/t)) / (B*(B-1)); off-diag blocks use the full mean.
    diag_mean_d = (blockdiag - c_pos) * (1.0 / (B * (B - 1)))                         # [D,1]
    sd = block_sums * (1.0 / (B * B)) * (1.0 - eye_d) + eye_d * diag_mean_d
    fro_ss = jnp.sum(jnp.sum(sd * sd, axis=-1, keepdims=True), axis=0, keepdims=True)
    sd = sd * lax.rsqrt(fro_ss)                                                       # / ||sd||_F
    # F.kl_div(log(softmax(sd)), softmax(attd), reduction='batchmean') on D*D elements,
    # via log-softmax (no exp->log round trip).
    log_attd = attd - _logsumexp_rows(attd)
    log_sd = sd - _logsumexp_rows(sd)
    kl_el = jnp.exp(log_attd) * (log_attd - log_sd)                                   # [D,D]
    reg_loss = jnp.sum(jnp.sum(kl_el, axis=-1, keepdims=True),
                       axis=0, keepdims=True) * (1.0 / (D * D))                       # [1,1]

    loss_ref[:, 0:1] = inner_loss
    loss_ref[:, 1:2] = reg_loss


def fused_eval_kernel(pooled_ref, proj_w_ref, proj_b_ref, w_rep_ref,
                      rec_data_ref, w_rec_ref, rec_b_ref, bpool_ref, logits_ref):
    """Eval path: projection + CTR head only (no contrastive losses)."""
    x1 = jnp.tanh(jnp.dot(pooled_ref[...], proj_w_ref[...],
                          preferred_element_type=jnp.float32) + proj_b_ref[...])      # [DB,E]
    x1w_bf = (x1 * w_rep_ref[...]).astype(jnp.bfloat16)
    pooled_lg = jnp.dot(bpool_ref[...], x1w_bf, preferred_element_type=jnp.float32)   # [B,E]
    logits_text = jnp.sum(pooled_lg, axis=-1, keepdims=True)                          # [B,1]
    rec_contrib = jnp.sum(rec_data_ref[...] * w_rec_ref[...], axis=-1, keepdims=True)
    z = logits_text + rec_contrib + rec_b_ref[...]
    logits_ref[...] = 1.0 / (1.0 + jnp.exp(-z))


# ---------------- Pallas wrappers (grid-less, whole-array VMEM blocks) ----------------
def ctr_train_step(params, consts, pooled_bf, rec_data):
    kern = functools.partial(fused_train_kernel, inv_t=1.0 / T,
                             c_pos=C_POS, log_c_pos=LOG_C_POS)
    logits, losses = pl.pallas_call(
        kern,
        out_shape=(jax.ShapeDtypeStruct((B, 1), jnp.float32),
                   jax.ShapeDtypeStruct((1, 2), jnp.float32)),
    )(pooled_bf, params["proj_w_bf"], params["proj_b"], params["w_rep"],
      rec_data, params["w_rec_row"], params["rec_b"],
      consts["pool_cat_bf"], consts["dpool"], consts["eye_d"])
    return logits, losses[0, 0], losses[0, 1]


def ctr_eval_step(params, consts, pooled_bf, rec_data):
    return pl.pallas_call(
        fused_eval_kernel,
        out_shape=jax.ShapeDtypeStruct((B, 1), jnp.float32),
    )(pooled_bf, params["proj_w_bf"], params["proj_b"], params["w_rep"],
      rec_data, params["w_rec_row"], params["rec_b"], consts["bpool_bf"])


# ---------------- model pieces ----------------
def build_constants():
    """Static pooling / selection matrices (functions of D and B only)."""
    r = np.arange(DB)
    dpool = (r[None, :] // B == np.arange(D)[:, None]).astype(np.float32)   # [D,DB]
    bpool = (r[None, :] % B == np.arange(B)[:, None]).astype(np.float32)    # [B,DB]
    pool_cat = np.concatenate([bpool, dpool], axis=0)                       # [B+D,DB]
    return {
        "dpool": jnp.asarray(dpool),
        "eye_d": jnp.asarray(np.eye(D, dtype=np.float32)),
        "pool_cat_bf": jnp.asarray(pool_cat).astype(jnp.bfloat16),
        "bpool_bf": jnp.asarray(bpool).astype(jnp.bfloat16),
    }


def init_params(key):
    k_emb, k_pw, k_rw = jax.random.split(key, 3)
    K = D * E + F_REC
    proj_w = jax.random.normal(k_pw, (H, E), jnp.float32) / jnp.sqrt(H)
    rec_w = jax.random.normal(k_rw, (K, 1), jnp.float32) / jnp.sqrt(K)
    return {
        "emb_table": 0.02 * jax.random.normal(k_emb, (V, H), jnp.float32),
        "proj_w_bf": proj_w.astype(jnp.bfloat16),          # bf16 MXU operand (f32 accumulation)
        "proj_b": jnp.zeros((1, E), jnp.float32),
        # CTR head weights pre-laid-out for the fused kernel: text part [D*E,1] as
        # per-domain rows repeated over the batch ([DB,E]); struct part as [1,F_REC].
        "w_rep": jnp.repeat(rec_w[:D * E].reshape(D, E), B, axis=0),
        "w_rec_row": rec_w[D * E:].reshape(1, F_REC),
        "rec_b": jnp.zeros((1, 1), jnp.float32),
    }


def text_encoder_pool(params, input_ids, attention_mask):
    # TODO(synk): stand-in for the pretrained BERT/SFR TextEncoder backbone
    # (embedding gather + masked mean-pool); the projection matmul runs in Pallas.
    emb = params["emb_table"][input_ids]                       # [D,B,L,H]
    mask = attention_mask.astype(jnp.float32)[..., None]       # [D,B,L,1]
    pooled = jnp.sum(emb * mask, axis=2) / jnp.maximum(jnp.sum(mask, axis=2), 1e-6)
    return pooled.reshape(DB, H).astype(jnp.bfloat16)          # domain-major rows, bf16 operand


def bert_ctr_forward(params, consts, batch, mode="train"):
    pooled = text_encoder_pool(params, batch["input_ids"], batch["attention_mask"])
    if mode == "train":
        logits, inner, reg = ctr_train_step(params, consts, pooled, batch["rec_data"])
        return logits, [inner, reg]
    logits = ctr_eval_step(params, consts, pooled, batch["rec_data"])
    return logits, []


# ---------------- main ----------------
if __name__ == "__main__":
    key = jax.random.PRNGKey(0)
    k_params, k_ids, k_mask, k_rec = jax.random.split(key, 4)

    params = init_params(k_params)
    consts = build_constants()

    input_ids = jax.random.randint(k_ids, (D, B, L), 0, V, dtype=jnp.int32)
    attention_mask = (jax.random.uniform(k_mask, (D, B, L)) < 0.8).astype(jnp.int32)
    attention_mask = attention_mask.at[:, :, 0].set(1)  # at least one valid token
    rec_data = jax.random.normal(k_rec, (B, F_REC), jnp.float32)

    batch = {"input_ids": input_ids, "attention_mask": attention_mask, "rec_data": rec_data}

    logits, losses = bert_ctr_forward(params, consts, batch, mode="train")
    jax.block_until_ready(logits)
    for l in losses:
        jax.block_until_ready(l)

    logits_eval, losses_eval = bert_ctr_forward(params, consts, batch, mode="eval")
    jax.block_until_ready(logits_eval)

    assert logits.shape == (B, 1) and logits_eval.shape == (B, 1)
    assert len(losses) == 2 and len(losses_eval) == 0
    assert all(bool(jnp.isfinite(l)) for l in losses)
    assert bool(jnp.all(jnp.isfinite(logits)))
    assert bool(jnp.all(jnp.isfinite(logits_eval)))
    print("KERNEL_OK")
</pallas_src>

<mosaic_0001>
module attributes {stable_mosaic.version = 11 : i64} {
  func.func @fused_train_kernel(%arg0: memref<32x128xbf16, #tpu.memory_space<vmem>>, %arg1: memref<128x128xbf16, #tpu.memory_space<vmem>>, %arg2: memref<1x128xf32, #tpu.memory_space<vmem>>, %arg3: memref<32x128xf32, #tpu.memory_space<vmem>>, %arg4: memref<8x16xf32, #tpu.memory_space<vmem>>, %arg5: memref<1x16xf32, #tpu.memory_space<vmem>>, %arg6: memref<1x1xf32, #tpu.memory_space<vmem>>, %arg7: memref<12x32xbf16, #tpu.memory_space<vmem>>, %arg8: memref<4x32xf32, #tpu.memory_space<vmem>>, %arg9: memref<4x4xf32, #tpu.memory_space<vmem>>, %arg10: memref<8x1xf32, #tpu.memory_space<vmem>>, %arg11: memref<1x2xf32, #tpu.memory_space<vmem>>) attributes {dimension_semantics = [], scalar_prefetch = 0 : i64, scratch_operands = 0 : i64, tpu.core_type = #tpu.core_type<tc>} {
    %c0 = arith.constant 0 : index
    %c0_0 = arith.constant 0 : index
    %0 = vector.load %arg0[%c0, %c0_0] : memref<32x128xbf16, #tpu.memory_space<vmem>>, vector<32x128xbf16>
    %c0_1 = arith.constant 0 : index
    %c0_2 = arith.constant 0 : index
    %1 = vector.load %arg1[%c0_1, %c0_2] : memref<128x128xbf16, #tpu.memory_space<vmem>>, vector<128x128xbf16>
    %cst = arith.constant dense<0.000000e+00> : vector<32x128xf32>
    %2 = tpu.matmul %0, %1, %cst {dimension_numbers = #tpu.dot_dimension_numbers<[1], [0], [0], [1], [0, 0, 1, 1], [], []>} : vector<32x128xbf16>, vector<128x128xbf16>, vector<32x128xf32> -> vector<32x128xf32>
    %c0_3 = arith.constant 0 : index
    %c0_4 = arith.constant 0 : index
    %3 = vector.load %arg2[%c0_3, %c0_4] : memref<1x128xf32, #tpu.memory_space<vmem>>, vector<1x128xf32>
    %4 = vector.broadcast %3 : vector<1x128xf32> to vector<32x128xf32>
    %5 = arith.addf %2, %4 : vector<32x128xf32>
    %6 = math.tanh %5 : vector<32x128xf32>
    %7 = arith.truncf %6 : vector<32x128xf32> to vector<32x128xbf16>
    %c0_5 = arith.constant 0 : index
    %c0_6 = arith.constant 0 : index
    %8 = vector.load %arg3[%c0_5, %c0_6] : memref<32x128xf32, #tpu.memory_space<vmem>>, vector<32x128xf32>
    %9 = arith.mulf %6, %8 : vector<32x128xf32>
    %10 = arith.truncf %9 : vector<32x128xf32> to vector<32x128xbf16>
    %11 = tpu.concatenate %7, %10 in 1 : vector<32x128xbf16>, vector<32x128xbf16> -> vector<32x256xbf16>
    %c0_7 = arith.constant 0 : index
    %c0_8 = arith.constant 0 : index
    %12 = vector.load %arg7[%c0_7, %c0_8] : memref<12x32xbf16, #tpu.memory_space<vmem>>, vector<12x32xbf16>
    %cst_9 = arith.constant dense<0.000000e+00> : vector<12x256xf32>
    %13 = tpu.matmul %12, %11, %cst_9 {dimension_numbers = #tpu.dot_dimension_numbers<[1], [0], [0], [1], [0, 0, 1, 1], [], []>} : vector<12x32xbf16>, vector<32x256xbf16>, vector<12x256xf32> -> vector<12x256xf32>
    %14 = vector.extract_strided_slice %13 {offsets = [0, 128], sizes = [8, 128], strides = [1, 1]} : vector<12x256xf32> to vector<8x128xf32>
    %cst_10 = arith.constant dense<0.000000e+00> : vector<8xf32>
    %15 = vector.multi_reduction <add>, %14, %cst_10 [1] : vector<8x128xf32> to vector<8xf32>
    %16 = vector.shape_cast %15 : vector<8xf32> to vector<8x1xf32>
    %17 = vector.extract_strided_slice %13 {offsets = [8, 0], sizes = [4, 128], strides = [1, 1]} : vector<12x256xf32> to vector<4x128xf32>
    %cst_11 = arith.constant 1.250000e-01 : f32
    %18 = vector.broadcast %cst_11 : f32 to vector<4x128xf32>
    %19 = arith.mulf %17, %18 : vector<4x128xf32>
    %c0_12 = arith.constant 0 : index
    %c0_13 = arith.constant 0 : index
    %20 = vector.load %arg4[%c0_12, %c0_13] : memref<8x16xf32, #tpu.memory_space<vmem>>, vector<8x16xf32>
    %c0_14 = arith.constant 0 : index
    %c0_15 = arith.constant 0 : index
    %21 = vector.load %arg5[%c0_14, %c0_15] : memref<1x16xf32, #tpu.memory_space<vmem>>, vector<1x16xf32>
    %22 = vector.broadcast %21 : vector<1x16xf32> to vector<8x16xf32>
    %23 = arith.mulf %20, %22 : vector<8x16xf32>
    %cst_16 = arith.constant dense<0.000000e+00> : vector<8xf32>
    %24 = vector.multi_reduction <add>, %23, %cst_16 [1] : vector<8x16xf32> to vector<8xf32>
    %25 = vector.shape_cast %24 : vector<8xf32> to vector<8x1xf32>
    %26 = arith.addf %16, %25 : vector<8x1xf32>
    %c0_17 = arith.constant 0 : index
    %c0_18 = arith.constant 0 : index
    %27 = vector.load %arg6[%c0_17, %c0_18] : memref<1x1xf32, #tpu.memory_space<vmem>>, vector<1x1xf32>
    %28 = vector.broadcast %27 : vector<1x1xf32> to vector<8x1xf32>
    %29 = arith.addf %26, %28 : vector<8x1xf32>
    %cst_19 = arith.constant 0.000000e+00 : f32
    %30 = vector.broadcast %cst_19 : f32 to vector<8x1xf32>
    %31 = arith.subf %30, %29 : vector<8x1xf32>
    %32 = math.exp %31 : vector<8x1xf32>
    %cst_20 = arith.constant 1.000000e+00 : f32
    %33 = vector.broadcast %cst_20 : f32 to vector<8x1xf32>
    %34 = arith.addf %33, %32 : vector<8x1xf32>
    %cst_21 = arith.constant 1.000000e+00 : f32
    %35 = vector.broadcast %cst_21 : f32 to vector<8x1xf32>
    %36 = arith.divf %35, %34 : vector<8x1xf32>
    %c0_22 = arith.constant 0 : index
    %c0_23 = arith.constant 0 : index
    %37 = vector.load %arg10[%c0_22, %c0_23] : memref<8x1xf32, #tpu.memory_space<vmem>>, vector<8x1xf32>
    tpu.vector_store %arg10[%c0_22, %c0_23], %36 {strides = array<i32>} : memref<8x1xf32, #tpu.memory_space<vmem>>, vector<8x1xf32>,
    %38 = arith.mulf %6, %6 : vector<32x128xf32>
    %cst_24 = arith.constant dense<0.000000e+00> : vector<32xf32>
    %39 = vector.multi_reduction <add>, %38, %cst_24 [1] : vector<32x128xf32> to vector<32xf32>
    %40 = vector.shape_cast %39 : vector<32xf32> to vector<32x1xf32>
    %cst_25 = arith.constant 1.000000e-16 : f32
    %41 = vector.broadcast %cst_25 : f32 to vector<32x1xf32>
    %42 = arith.maximumf %40, %41 : vector<32x1xf32>
    %43 = math.rsqrt %42 : vector<32x1xf32>
    %44 = vector.broadcast %43 : vector<32x1xf32> to vector<32x128xf32>
    %45 = arith.mulf %6, %44 : vector<32x128xf32>
    %46 = arith.truncf %45 : vector<32x128xf32> to vector<32x128xbf16>
    %cst_26 = arith.constant dense<0.000000e+00> : vector<32x32xf32>
    %47 = tpu.matmul %46, %46, %cst_26 {dimension_numbers = #tpu.dot_dimension_numbers<[1], [1], [0], [0], [0, 0, 1, 0], [], []>} : vector<32x128xbf16>, vector<32x128xbf16>, vector<32x32xf32> -> vector<32x32xf32>
    %cst_27 = arith.constant 2.000000e+00 : f32
    %48 = vector.broadcast %cst_27 : f32 to vector<32x32xf32>
    %49 = arith.mulf %47, %48 : vector<32x32xf32>
    %50 = math.exp %49 : vector<32x32xf32>
    %c0_28 = arith.constant 0 : index
    %c0_29 = arith.constant 0 : index
    %51 = vector.load %arg8[%c0_28, %c0_29] : memref<4x32xf32, #tpu.memory_space<vmem>>, vector<4x32xf32>
    %cst_30 = arith.constant dense<0.000000e+00> : vector<4x32xf32>
    %52 = tpu.matmul %51, %50, %cst_30 {dimension_numbers = #tpu.dot_dimension_numbers<[1], [0], [0], [1], [0, 0, 1, 1], [], []>} : vector<4x32xf32>, vector<32x32xf32>, vector<4x32xf32> -> vector<4x32xf32>
    %c0_31 = arith.constant 0 : index
    %c0_32 = arith.constant 0 : index
    %53 = vector.load %arg8[%c0_31, %c0_32] : memref<4x32xf32, #tpu.memory_space<vmem>>, vector<4x32xf32>
    %cst_33 = arith.constant dense<0.000000e+00> : vector<4x4xf32>
    %54 = tpu.matmul %52, %53, %cst_33 {dimension_numbers = #tpu.dot_dimension_numbers<[1], [1], [0], [0], [0, 0, 1, 0], [], []>} : vector<4x32xf32>, vector<4x32xf32>, vector<4x4xf32> -> vector<4x4xf32>
    %c0_34 = arith.constant 0 : index
    %c0_35 = arith.constant 0 : index
    %55 = vector.load %arg9[%c0_34, %c0_35] : memref<4x4xf32, #tpu.memory_space<vmem>>, vector<4x4xf32>
    %56 = arith.mulf %54, %55 : vector<4x4xf32>
    %cst_36 = arith.constant dense<0.000000e+00> : vector<4xf32>
    %57 = vector.multi_reduction <add>, %56, %cst_36 [1] : vector<4x4xf32> to vector<4xf32>
    %58 = vector.shape_cast %57 : vector<4xf32> to vector<4x1xf32>
    %59 = math.log %58 : vector<4x1xf32>
    %cst_37 = arith.constant 4.07944155 : f32
    %60 = vector.broadcast %cst_37 : f32 to vector<4x1xf32>
    %61 = arith.subf %59, %60 : vector<4x1xf32>
    %cst_38 = arith.constant dense<0.000000e+00> : vector<1xf32>
    %62 = vector.multi_reduction <add>, %61, %cst_38 [0] : vector<4x1xf32> to vector<1xf32>
    %63 = vector.shape_cast %62 : vector<1xf32> to vector<1x1xf32>
    %cst_39 = arith.constant 2.500000e-01 : f32
    %64 = vector.broadcast %cst_39 : f32 to vector<1x1xf32>
    %65 = arith.mulf %63, %64 : vector<1x1xf32>
    %66 = arith.mulf %19, %19 : vector<4x128xf32>
    %cst_40 = arith.constant dense<0.000000e+00> : vector<4xf32>
    %67 = vector.multi_reduction <add>, %66, %cst_40 [1] : vector<4x128xf32> to vector<4xf32>
    %68 = vector.shape_cast %67 : vector<4xf32> to vector<4x1xf32>
    %cst_41 = arith.constant 1.000000e-16 : f32
    %69 = vector.broadcast %cst_41 : f32 to vector<4x1xf32>
    %70 = arith.maximumf %68, %69 : vector<4x1xf32>
    %71 = math.rsqrt %70 : vector<4x1xf32>
    %72 = vector.broadcast %71 : vector<4x1xf32> to vector<4x128xf32>
    %73 = arith.mulf %19, %72 : vector<4x128xf32>
    %74 = arith.truncf %73 : vector<4x128xf32> to vector<4x128xbf16>
    %cst_42 = arith.constant dense<0.000000e+00> : vector<4x4xf32>
    %75 = tpu.matmul %74, %74, %cst_42 {dimension_numbers = #tpu.dot_dimension_numbers<[1], [1], [0], [0], [0, 0, 1, 0], [], []>} : vector<4x128xbf16>, vector<4x128xbf16>, vector<4x4xf32> -> vector<4x4xf32>
    %cst_43 = arith.constant 59.1124496 : f32
    %76 = vector.broadcast %cst_43 : f32 to vector<4x1xf32>
    %77 = arith.subf %58, %76 : vector<4x1xf32>
    %cst_44 = arith.constant 0.0178571437 : f32
    %78 = vector.broadcast %cst_44 : f32 to vector<4x1xf32>
    %79 = arith.mulf %77, %78 : vector<4x1xf32>
    %cst_45 = arith.constant 1.562500e-02 : f32
    %80 = vector.broadcast %cst_45 : f32 to vector<4x4xf32>
    %81 = arith.mulf %54, %80 : vector<4x4xf32>
    %cst_46 = arith.constant 1.000000e+00 : f32
    %82 = vector.broadcast %cst_46 : f32 to vector<4x4xf32>
    %83 = arith.subf %82, %55 : vector<4x4xf32>
    %84 = arith.mulf %81, %83 : vector<4x4xf32>
    %85 = vector.broadcast %79 : vector<4x1xf32> to vector<4x4xf32>
    %86 = arith.mulf %55, %85 : vector<4x4xf32>
    %87 = arith.addf %84, %86 : vector<4x4xf32>
    %88 = arith.mulf %87, %87 : vector<4x4xf32>
    %cst_47 = arith.constant dense<0.000000e+00> : vector<4xf32>
    %89 = vector.multi_reduction <add>, %88, %cst_47 [1] : vector<4x4xf32> to vector<4xf32>
    %90 = vector.shape_cast %89 : vector<4xf32> to vector<4x1xf32>
    %cst_48 = arith.constant dense<0.000000e+00> : vector<1xf32>
    %91 = vector.multi_reduction <add>, %90, %cst_48 [0] : vector<4x1xf32> to vector<1xf32>
    %92 = vector.shape_cast %91 : vector<1xf32> to vector<1x1xf32>
    %93 = math.rsqrt %92 : vector<1x1xf32>
    %94 = vector.broadcast %93 : vector<1x1xf32> to vector<4x4xf32>
    %95 = arith.mulf %87, %94 : vector<4x4xf32>
    %cst_49 = arith.constant dense<0xFF800000> : vector<4xf32>
    %96 = vector.multi_reduction <maximumf>, %75, %cst_49 [1] : vector<4x4xf32> to vector<4xf32>
    %97 = vector.shape_cast %96 : vector<4xf32> to vector<4x1xf32>
    %98 = vector.broadcast %97 : vector<4x1xf32> to vector<4x4xf32>
    %99 = arith.subf %75, %98 : vector<4x4xf32>
    %100 = math.exp %99 : vector<4x4xf32>
    %cst_50 = arith.constant dense<0.000000e+00> : vector<4xf32>
    %101 = vector.multi_reduction <add>, %100, %cst_50 [1] : vector<4x4xf32> to vector<4xf32>
    %102 = vector.shape_cast %101 : vector<4xf32> to vector<4x1xf32>
    %103 = math.log %102 : vector<4x1xf32>
    %104 = arith.addf %97, %103 : vector<4x1xf32>
    %105 = vector.broadcast %104 : vector<4x1xf32> to vector<4x4xf32>
    %106 = arith.subf %75, %105 : vector<4x4xf32>
    %cst_51 = arith.constant dense<0xFF800000> : vector<4xf32>
    %107 = vector.multi_reduction <maximumf>, %95, %cst_51 [1] : vector<4x4xf32> to vector<4xf32>
    %108 = vector.shape_cast %107 : vector<4xf32> to vector<4x1xf32>
    %109 = vector.broadcast %108 : vector<4x1xf32> to vector<4x4xf32>
    %110 = arith.subf %95, %109 : vector<4x4xf32>
    %111 = math.exp %110 : vector<4x4xf32>
    %cst_52 = arith.constant dense<0.000000e+00> : vector<4xf32>
    %112 = vector.multi_reduction <add>, %111, %cst_52 [1] : vector<4x4xf32> to vector<4xf32>
    %113 = vector.shape_cast %112 : vector<4xf32> to vector<4x1xf32>
    %114 = math.log %113 : vector<4x1xf32>
    %115 = arith.addf %108, %114 : vector<4x1xf32>
    %116 = vector.broadcast %115 : vector<4x1xf32> to vector<4x4xf32>
    %117 = arith.subf %95, %116 : vector<4x4xf32>
    %118 = math.exp %106 : vector<4x4xf32>
    %119 = arith.subf %106, %117 : vector<4x4xf32>
    %120 = arith.mulf %118, %119 : vector<4x4xf32>
    %cst_53 = arith.constant dense<0.000000e+00> : vector<4xf32>
    %121 = vector.multi_reduction <add>, %120, %cst_53 [1] : vector<4x4xf32> to vector<4xf32>
    %122 = vector.shape_cast %121 : vector<4xf32> to vector<4x1xf32>
    %cst_54 = arith.constant dense<0.000000e+00> : vector<1xf32>
    %123 = vector.multi_reduction <add>, %122, %cst_54 [0] : vector<4x1xf32> to vector<1xf32>
    %124 = vector.shape_cast %123 : vector<1xf32> to vector<1x1xf32>
    %cst_55 = arith.constant 6.250000e-02 : f32
    %125 = vector.broadcast %cst_55 : f32 to vector<1x1xf32>
    %126 = arith.mulf %124, %125 : vector<1x1xf32>
    %c0_56 = arith.constant 0 : index
    %c0_57 = arith.constant 0 : index
    %127 = vector.load %arg11[%c0_56, %c0_57] : memref<1x2xf32, #tpu.memory_space<vmem>>, vector<1x1xf32>
    tpu.vector_store %arg11[%c0_56, %c0_57], %65 {strides = array<i32>} : memref<1x2xf32, #tpu.memory_space<vmem>>, vector<1x1xf32>,
    %c0_58 = arith.constant 0 : index
    %c1 = arith.constant 1 : index
    %128 = vector.load %arg11[%c0_58, %c1] : memref<1x2xf32, #tpu.memory_space<vmem>>, vector<1x1xf32>
    tpu.vector_store %arg11[%c0_58, %c1], %126 {strides = array<i32>} : memref<1x2xf32, #tpu.memory_space<vmem>>, vector<1x1xf32>,
    return
  }
}

</mosaic_0001>

<bundles_post_ra>
// kernel: tpu_custom_call.1
= control target key start
LH: loop header
LB: loop body
LE: loop exit
PB: predicated region body
PF: predicated region fallthrough
CT: control target
= control target key end

     0   :  { %s1200_s0 = inlined_call_operand.hbm [shape: bf16[32,128], index: 0, kind: input, shape index: {}]   ;;  %s1201_s1 = inlined_call_operand.hbm [shape: bf16[128,128], index: 1, kind: input, shape index: {}]   ;;  %s1202_s2 = inlined_call_operand.hbm [shape: f32[1,128], index: 2, kind: input, shape index: {}]   ;;  %s1203_s3 = inlined_call_operand.hbm [shape: f32[32,128], index: 3, kind: input, shape index: {}]   ;;  %s1204_s4 = inlined_call_operand.vmem [shape: f32[8,16], index: 4, kind: input, shape index: {}]   ;;  %s1205_s5 = inlined_call_operand.hbm [shape: f32[1,16], index: 5, kind: input, shape index: {}]   ;;  %s1206_s6 = inlined_call_operand.<no memory space> [shape: f32[1,1], index: 6, kind: input, shape index: {}]   ;;  %s1207_s7 = inlined_call_operand.hbm [shape: bf16[12,32], index: 7, kind: input, shape index: {}]   ;;  %s1208_s8 = inlined_call_operand.vmem [shape: f32[4,32], index: 8, kind: input, shape index: {}]   ;;  %s1209_s9 = inlined_call_operand.vmem [shape: f32[4,4], index: 9, kind: input, shape index: {}]   ;;  %s1210_s10 = inlined_call_operand.vmem [shape: f32[8,1], index: 10, kind: output, shape index: {0}]   ;;  %s1211_s11 = inlined_call_operand.hbm [shape: f32[1,2], index: 11, kind: output, shape index: {1}]  }
   0x1   :  { %v17_v0 = vstv %s1206_s6 }
   0x2   :  { %18 = vst [vmem:[#allocation2] sm:$0x1] %v17_v0 }
   0x3   :  { %19 = vsyncpa [#allocation4], 0 }
   0x4   :  { %20 = vsyncpa [#allocation7], 0 }
   0x5   :  { %21 = vsyncpa [#allocation10], 0 }
   0x6   :  { %22 = vsyncpa [#allocation13], 0 }
   0x7   :  { %23 = vsyncpa [#allocation5], 0  ;;  %s1055_s19 = smov [#allocation6]   ;;  %s1056_s21 = smov [#allocation9]  }
   0x8   :  { %s41_s20 = sshll.u32 %s1055_s19, 4  ;;  %s63_s22 = sshll.u32 %s1056_s21, 4  ;;  %s42_s20 = int_to_ptr.vmem [resolvable:$true] %s41_s20  ;;  %s64_s22 = int_to_ptr.vmem [resolvable:$true] %s63_s22 }
   0x9   :  { %s913_s23 = scalar_lea.vmem %s42_s20, 1024  ;;  %p918_p1 = scmp.lt.s32.totalorder %s42_s20, %s42_s20 }
   0xa   :  { %p914_p0 = scmp.ne.s32.totalorder %s42_s20, %s913_s23  ;;  %p919_p2 = scmp.lt.s32.totalorder %s913_s23, %s913_s23 }
   0xc   :  { %p920_p3 = por %p919_p2, %p918_p1 }
   0xe   :  { %p921_p4 = pnand %p920_p3, %p914_p0 }
  0x10   :  { %924 = shalt.err (!%p921_p4)
}
  0x11   :  { %s1057_s6 = smov 64   ;;  %s1058_s24 = smov 4  }
  0x12   :  { %47 = dma.hbm_to_vmem [thread:$0]  %s1201_s1, 1024, %s42_s20, [#allocation7], %s1057_s6, %s1057_s6, %s1058_s24  }
  0x13   :  { %s933_s27 = scalar_lea.vmem %s64_s22, 512  ;;  %p938_p6 = scmp.lt.s32.totalorder %s64_s22, %s64_s22 }
  0x14   :  { %p934_p5 = scmp.ne.s32.totalorder %s64_s22, %s933_s27  ;;  %p939_p7 = scmp.lt.s32.totalorder %s933_s27, %s933_s27 }
  0x16   :  { %p940_p8 = por %p939_p7, %p938_p6 }
  0x18   :  { %p941_p9 = pnand %p940_p8, %p934_p5 }
  0x1a   :  { %944 = shalt.err (!%p941_p9)
}
  0x1b   :  { %s1059_s28 = smov 128   ;;  %s1060_s29 = smov 8  }
  0x1c   :  { %69 = dma.hbm_to_vmem [thread:$0]  %s1203_s3, 512, %s64_s22, [#allocation10], %s1059_s28, %s1059_s28, %s1060_s29  }
  0x1d   :  { %s1061_s13 = smov [#allocation3]   ;;  %s1062_s15 = smov [#allocation8]  }
  0x1e   :  { %s29_s14 = sshll.u32 %s1061_s13, 4  ;;  %s54_s16 = sshll.u32 %s1062_s15, 4  ;;  %s30_s14 = int_to_ptr.vmem [resolvable:$true] %s29_s14  ;;  %s55_s16 = int_to_ptr.vmem [resolvable:$true] %s54_s16 }
  0x1f   :  { %s953_s1 = scalar_lea.vmem %s30_s14, 256  ;;  %p958_p11 = scmp.lt.s32.totalorder %s30_s14, %s30_s14 }
  0x20   :  { %p954_p10 = scmp.ne.s32.totalorder %s30_s14, %s953_s1  ;;  %p959_p12 = scmp.lt.s32.totalorder %s953_s1, %s953_s1 }
  0x22   :  { %p960_p13 = por %p959_p12, %p958_p11 }
  0x24   :  { %p961_p0 = pnand %p960_p13, %p954_p10 }
  0x26   :  { %964 = shalt.err (!%p961_p0)
}
  0x27   :  { %35 = dma.hbm_to_vmem [thread:$0]  %s1200_s0, 256, %s30_s14, [#allocation4], %s1057_s6, %s1057_s6, %s1058_s24  }
  0x28   :  { %s973_s3 = scalar_lea.vmem %s55_s16, 16  ;;  %s977_s19 = scalar_lea.vmem %s55_s16, 32 }
  0x29   :  { %p974_p1 = scmp.ne.s32.totalorder %s55_s16, %s973_s3  ;;  %p978_p2 = scmp.lt.s32.totalorder %s55_s16, %s55_s16 }
  0x2a   :  { %p979_p3 = scmp.lt.s32.totalorder %s977_s19, %s973_s3 }
  0x2c   :  { %p980_p4 = por %p979_p3, %p978_p2 }
  0x2e   :  { %p981_p5 = pnand %p980_p4, %p974_p1 }
  0x30   :  { %984 = shalt.err (!%p981_p5)
}
  0x31   :  { %57 = dma.hbm_to_vmem [thread:$0]  %s1202_s2, 16, %s55_s16, [#allocation7]  }
  0x32   :  { %s1063_s22 = smov [#allocation11]   ;;  %s1064_s25 = smov [#allocation12]  }
  0x33   :  { %s78_s23 = sshll.u32 %s1063_s22, 4  ;;  %s89_s26 = sshll.u32 %s1064_s25, 4  ;;  %s79_s23 = int_to_ptr.vmem [resolvable:$true] %s78_s23  ;;  %s90_s26 = int_to_ptr.vmem [resolvable:$true] %s89_s26 }
  0x34   :  { %s993_s27 = scalar_lea.vmem %s79_s23, 16  ;;  %s997_s0 = scalar_lea.vmem %s79_s23, 32 }
  0x35   :  { %p994_p6 = scmp.ne.s32.totalorder %s79_s23, %s993_s27  ;;  %p998_p7 = scmp.lt.s32.totalorder %s79_s23, %s79_s23 }
  0x36   :  { %p999_p8 = scmp.lt.s32.totalorder %s997_s0, %s993_s27 }
  0x38   :  { %p1000_p9 = por %p999_p8, %p998_p7 }
  0x3a   :  { %p1001_p10 = pnand %p1000_p9, %p994_p6 }
  0x3c   :  { %1004 = shalt.err (!%p1001_p10)
}
  0x3d   :  { %81 = dma.hbm_to_vmem [thread:$0]  %s1205_s5, 16, %s79_s23, [#allocation10]  }
  0x3e   :  { %s1013_s30 = scalar_lea.vmem %s90_s26, 128  ;;  %p1018_p12 = scmp.lt.s32.totalorder %s90_s26, %s90_s26 }
  0x3f   :  { %p1014_p11 = scmp.ne.s32.totalorder %s90_s26, %s1013_s30  ;;  %p1019_p13 = scmp.lt.s32.totalorder %s1013_s30, %s1013_s30 }
  0x41   :  { %p1020_p0 = por %p1019_p13, %p1018_p12 }
  0x43   :  { %p1021_p1 = pnand %p1020_p0, %p1014_p11 }
  0x45   :  { %1024 = shalt.err (!%p1021_p1)
}
  0x46   :  { %95 = dma.hbm_to_vmem [thread:$0]  %s1207_s7, 128, %s90_s26, [#allocation13], %s1057_s6, %s1057_s6, %s1058_s24  }
  0x47   :  { %1045 = dma.done.wait [#allocation4], 256  }
  0x48   :  { %1046 = vsyncadd [#allocation4], 4294967040 }
  0x49   :  { %1047 = dma.done.wait [#allocation7], 1040  }
  0x4a   :  { %1048 = vsyncadd [#allocation7], 4294966256 }
  0x4b   :  { %1049 = dma.done.wait [#allocation10], 528  }
  0x4c   :  { %1050 = vsyncadd [#allocation10], 4294966768 }
  0x4d   :  { %1051 = dma.done.wait [#allocation13], 128  }
  0x4e   :  { %1052 = vsyncadd [#allocation13], 4294967168  ;;  %v850_v1 = vld [vmem:[#allocation6 + $0x38] sm:$0xff]   ;;  %v851_v2 = vld [vmem:[#allocation6 + $0x30] sm:$0xff]   ;;  %v1065_v11 = vmov 0   ;;  %vm278_vm0 = vcmask 261120  }
  0x4f   :  { %786 = vmatprep.subr.bf16.mxu0 %v850_v1  ;;  %v852_v3 = vld [vmem:[#allocation6 + $0x28] sm:$0xff]   ;;  %v853_v4 = vld [vmem:[#allocation6 + $0x20] sm:$0xff]   ;;  %v858_v5 = vld [vmem:[#allocation3] sm:$0xff]   ;;  %314 = vmatprep.mubr.bf16.mxu1 %v1065_v11  ;;  %vm599_vm1 = vcmask 1043456   ;;  %vm1067_vm2 = vmmov 0   ;;  %vm592_vm3 = vcmask 27648  }
  0x50   :  { %787 = vmatpush3.bf16.msra.mxu0 %v850_v1  ;;  %802 = vmatprep.mubr.bf16.mxu0 %v858_v5  ;;  %v854_v6 = vld [vmem:[#allocation6 + $0x18] sm:$0xff]   ;;  %v855_v7 = vld [vmem:[#allocation6 + $0x10] sm:$0xff]   ;;  %v856_v8 = vld [vmem:[#allocation6 + $0x8] sm:$0xff]   ;;  %vm717_vm4 = vcmask 0   ;;  %vm335_vm5 = vcmask 130048   ;;  %vm354_vm6 = vcmask 7168  }
  0x51   :  { %788 = vmatprep.subr.bf16.mxu0 %v851_v2  ;;  %v857_v9 = vld [vmem:[#allocation6] sm:$0xff]   ;;  %v859_v10 = vld [vmem:[#allocation3 + $0x8] sm:$0xff]   ;;  %v262_v29 = vld [vmem:[#allocation9 + $0x8] sm:$0xff]  ;;  %s1068_s14 = smov [#allocation14]   ;;  %vm719_vm7 = vcmask 8200  }
  0x52   :  { %v743_v12 = vld [vmem:[#allocation8] ss:$0 sm:$0xff]  ;;  %v263_v24 = vld [vmem:[#allocation9 + $0x10] sm:$0xff]  ;;  %v261_v28 = vld [vmem:[#allocation9] sm:$0xff]  ;;  %s729_s15 = sshll.u32 %s1068_s14, 4  ;;  %s730_s15 = int_to_ptr.vmem [resolvable:$true] %s729_s15 }
  0x53   :  { %v264_v25 = vld [vmem:[#allocation9 + $0x18] sm:$0xff]  ;;  %v860_v41 = vld [vmem:[#allocation12] sm:$0x3f]   ;;  %s1025_s16 = scalar_lea.vmem %s730_s15, 16  ;;  %s1029_s1 = scalar_lea.vmem %s730_s15, 32 }
  0x54   :  { %789 = vmatpush3.bf16.msra.mxu0 %v851_v2  ;;  %p1026_p2 = scmp.ne.s32.totalorder %s730_s15, %s1025_s16  ;;  %p1030_p3 = scmp.lt.s32.totalorder %s730_s15, %s730_s15 }
  0x55   :  { %790 = vmatprep.subr.bf16.mxu0 %v852_v3  ;;  %p1031_p4 = scmp.lt.s32.totalorder %s1029_s1, %s1025_s16 }
  0x57   :  { %p1032_p5 = por %p1031_p4, %p1030_p3 }
  0x58   :  { %791 = vmatpush3.bf16.msra.mxu0 %v852_v3  ;;  %v1066_v3 = vmov 0.0  }
  0x59   :  { %792 = vmatprep.subr.bf16.mxu0 %v853_v4  ;;  %p1033_p6 = pnand %p1032_p5, %p1026_p2 }
  0x5c   :  { %793 = vmatpush3.bf16.msra.mxu0 %v853_v4 }
  0x5d   :  { %794 = vmatprep.subr.bf16.mxu0 %v854_v6 }
  0x60   :  { %795 = vmatpush3.bf16.msra.mxu0 %v854_v6 }
  0x61   :  { %796 = vmatprep.subr.bf16.mxu0 %v855_v7 }
  0x64   :  { %797 = vmatpush3.bf16.msra.mxu0 %v855_v7 }
  0x65   :  { %798 = vmatprep.subr.bf16.mxu0 %v856_v8 }
  0x68   :  { %799 = vmatpush3.bf16.msra.mxu0 %v856_v8 }
  0x69   :  { %800 = vmatprep.subr.bf16.mxu0 %v857_v9 }
  0x6c   :  { %801 = vmatpush3.bf16.msra.mxu0 %v857_v9 }
  0x6d   :  { %830 = vmatprep.subr.bf16.mxu0 %v1066_v3 }
  0x6f   :  { %803 = vmatmul.mubr.bf16.vlgmr.msra.gmra.mxu0 %v859_v10 }
  0x70   :  { %832 = vmatprep.mubr.msk.bf16.mxu0 %vm1067_vm2, %v1066_v3 }
 0x12f   :  { %v804_v13 = vpop.f32.mrf.mxu0 }
 0x130   :  { %v249_v14 = vadd.f32 %v804_v13, %v743_v12 }
 0x131   :  { %v240_v15 = vpop.f32.mrf.mxu0 }
 0x132   :  { %861 = vtanh.f32 %v249_v14  ;;  %v241_v16 = vadd.f32 %v743_v12, %v240_v15 }
 0x133   :  { %v805_v17 = vpop.f32.mrf.mxu0 }
 0x134   :  { %863 = vtanh.f32 %v241_v16  ;;  %v252_v18 = vadd.f32 %v805_v17, %v743_v12 }
 0x135   :  { %v243_v19 = vpop.f32.mrf.mxu0 }
 0x136   :  { %865 = vtanh.f32 %v252_v18  ;;  %v244_v20 = vadd.f32 %v743_v12, %v243_v19 }
 0x138   :  { %867 = vtanh.f32 %v244_v20 }
 0x13f   :  { %v862_v21 = vpop.eup %861 }
 0x140   :  { %v358_v22 = vmul.f32 %v862_v21, %v862_v21  ;;  %v267_v31 = vmul.f32 %v862_v21, %v263_v24  ;;  %v443_v24 = vld [vmem:[%s1208_s8] sm:$0xf] }
 0x141   :  { %v864_v23 = vpop.eup %863 }
 0x142   :  { %364 = vadd.xlane.f32.xlu0 %v358_v22  ;;  %v356_v26 = vmul.f32 %v864_v23, %v864_v23  ;;  %v265_v36 = vmul.f32 %v864_v23, %v261_v28 }
 0x143   :  { %v866_v27 = vpop.eup %865 }
 0x144   :  { %360 = vadd.xlane.f32.xlu1 %v356_v26  ;;  %v359_v30 = vmul.f32 %v866_v27, %v866_v27  ;;  %v268_v32 = vmul.f32 %v866_v27, %v264_v25  ;;  %v260_v38 = vpack.c.bf16 %v866_v27, %v862_v21 }
 0x145   :  { %v868_v33 = vpop.eup %867 }
 0x146   :  { %366 = vadd.xlane.f32.xlu0 %v359_v30  ;;  %v270_v34 = vpack.c.bf16 %v268_v32, %v267_v31  ;;  %v357_v35 = vmul.f32 %v868_v33, %v868_v33  ;;  %v266_v37 = vmul.f32 %v868_v33, %v262_v29  ;;  %v259_v40 = vpack.c.bf16 %v868_v33, %v864_v23  ;;  %v590_v32 = vld [vmem:[%s1209_s9] sm:$0xf] }
 0x148   :  { %294 = vmatprep.subr.bf16.mxu1 %v270_v34  ;;  %362 = vadd.xlane.f32.xlu1 %v357_v35  ;;  %v269_v39 = vpack.c.bf16 %v266_v37, %v265_v36 }
 0x149   :  { %295 = vmatpush1.bf16.msra.mxu1 %v260_v38 }
 0x14a   :  { %296 = vmatprep.subr.bf16.mxu1 %v269_v39 }
 0x14d   :  { %297 = vmatpush1.bf16.msra.mxu1 %v259_v40  ;;  %v659_v40 = vsub.f32 1.0, %v590_v32 }
 0x150   :  { %755 = vmatmul.mubr.msk.bf16.vlgmr.msra.gmra.mxu1 %vm278_vm0, %v860_v41 }
 0x1cb   :  { %v365_v42 = vpop.xlane.xlu0 %364 }
 0x1cc   :  { %v370_v43 = vmax.f32 %v365_v42, 1e-16 }
 0x1cd   :  { %v361_v44 = vpop.xlane.xlu1 %360 }
 0x1ce   :  { %v368_v45 = vmax.f32 %v361_v44, 1e-16  ;;  %869 = vrsqrt.f32 %v370_v43 }
 0x1cf   :  { %v367_v46 = vpop.xlane.xlu0 %366 }
 0x1d0   :  { %v371_v47 = vmax.f32 %v367_v46, 1e-16  ;;  %871 = vrsqrt.f32 %v368_v45 }
 0x1d1   :  { %v363_v48 = vpop.xlane.xlu1 %362 }
 0x1d2   :  { %873 = vrsqrt.f32 %v371_v47  ;;  %v369_v49 = vmax.f32 %v363_v48, 1e-16 }
 0x1d4   :  { %875 = vrsqrt.f32 %v369_v49 }
 0x1db   :  { %v870_v50 = vpop.eup %869 }
 0x1dc   :  { %v378_v53 = vmul.f32 %v870_v50, %v862_v21 }
 0x1dd   :  { %v872_v51 = vpop.eup %871 }
 0x1de   :  { %v376_v57 = vmul.f32 %v872_v51, %v864_v23 }
 0x1df   :  { %v874_v52 = vpop.eup %873 }
 0x1e0   :  { %v379_v54 = vmul.f32 %v874_v52, %v866_v27 }
 0x1e1   :  { %v876_v55 = vpop.eup %875 }
 0x1e2   :  { %v381_v56 = vpack.c.bf16 %v379_v54, %v378_v53  ;;  %v377_v58 = vmul.f32 %v876_v55, %v868_v33 }
 0x1e4   :  { %806 = vmatprep.subr.bf16.mxu1 %v381_v56  ;;  %v380_v59 = vpack.c.bf16 %v377_v58, %v376_v57 }
 0x1e5   :  { %807 = vmatpush3.bf16.xpose.msra.mxu1 %v381_v56 }
 0x1e6   :  { %808 = vmatprep.subr.bf16.mxu1 %v380_v59  ;;  %810 = vmatprep.mubr.bf16.mxu1 %v380_v59 }
 0x1ed   :  { %809 = vmatpush3.bf16.xpose.msra.mxu1 %v380_v59 }
 0x1ee   :  { %814 = vmatprep.subr.mxu1 %v1066_v3 }
 0x1f4   :  { %811 = vmatmul.mubr.bf16.vlgmr.msra.gmra.mxu1 %v381_v56 }
 0x1f5   :  { %822 = vmatprep.mubr.msk.f32.mxu1 %vm1067_vm2, %v1066_v3 }
 0x210   :  { %v316_v60 = vpop.f32.mrf.mxu1 }
 0x212   :  { %v1160_v61 = vpop.f32.mrf.mxu1 }
 0x214   :  { %v319_v62 = vpop.f32.mrf.mxu1 }
 0x215   :  { %v325_v63 = vmul.f32 0.125, %v319_v62 }
 0x216   :  { %v321_v0 = vpop.f32.mrf.mxu1 }
 0x217   :  { %v608_v1 = vmul.f32 %v325_v63, %v325_v63 }
 0x219   :  { %v609_v2 = vsel %vm599_vm1, %v608_v1, 0.0 }
 0x21a   :  { %610 = vadd.xlane.f32.xlu0 %v609_v2 }
 0x2a3   :  { %v611_v4 = vpop.xlane.xlu0 %610 }
 0x2a4   :  { %v612_v5 = vmax.f32 %v611_v4, 1e-16 }
 0x2a6   :  { %877 = vrsqrt.f32 %v612_v5 }
 0x2b3   :  { %v878_v6 = vpop.eup %877 }
 0x2b4   :  { %v812_v7 = vpop.f32.mrf.mxu1  ;;  %v614_v8 = vmul.f32 %v878_v6, %v325_v63 }
 0x2b5   :  { %v433_v11 = vmul.f32 2.0, %v812_v7 }
 0x2b6   :  { %v416_v9 = vpop.f32.mrf.mxu1  ;;  %v615_v10 = vpack.c.bf16 %v614_v8, %v614_v8 }
 0x2b7   :  { %v439_v15 = vmul.f32 1.442695, %v433_v11  ;;  %v431_v16 = vmul.f32 2.0, %v416_v9 }
 0x2b8   :  { %v813_v12 = vpop.f32.mrf.mxu1  ;;  %831 = vmatpush3.bf16.xpose.msra.mxu0 %v615_v10 }
 0x2b9   :  { %v434_v13 = vmul.f32 2.0, %v813_v12  ;;  %v435_v20 = vmul.f32 1.442695, %v431_v16 }
 0x2ba   :  { %v419_v14 = vpop.f32.mrf.mxu1 }
 0x2bb   :  { %v441_v17 = vmul.f32 1.442695, %v434_v13  ;;  %v432_v18 = vmul.f32 2.0, %v419_v14  ;;  %v326_v14 = vld [vmem:[%s1204_s4] sm:$0xff] }
 0x2bd   :  { %879 = vpow2.f32 %v441_v17  ;;  %v437_v19 = vmul.f32 1.442695, %v432_v18 }
 0x2be   :  { %881 = vpow2.f32 %v439_v15  ;;  %v756_v15 = vld [vmem:[#allocation11] ss:$0 sm:$0xff] }
 0x2bf   :  { %833 = vmatmul.mubr.bf16.vlgmr.msra.gmra.mxu0 %v615_v10  ;;  %883 = vpow2.f32 %v437_v19  ;;  %v334_v16 = vmul.f32 %v756_v15, %v326_v14 }
 0x2c0   :  { %885 = vpow2.f32 %v435_v20 }
 0x2c1   :  { %v336_v19 = vsel %vm335_vm5, %v334_v16, 0.0 }
 0x2ca   :  { %v880_v21 = vpop.eup %879 }
 0x2cb   :  { %815 = vmatpush3.msra.mxu1 %v880_v21  ;;  %v882_v22 = vpop.eup %881 }
 0x2cc   :  { %816 = vmatprep.subr.mxu1 %v1066_v3  ;;  %v884_v23 = vpop.eup %883 }
 0x2cd   :  { %817 = vmatpush3.msra.mxu1 %v882_v22  ;;  %v886_v25 = vpop.eup %885 }
 0x2ce   :  { %818 = vmatprep.subr.mxu1 %v1066_v3 }
 0x2cf   :  { %819 = vmatpush3.msra.mxu1 %v884_v23 }
 0x2d0   :  { %820 = vmatprep.subr.mxu1 %v1066_v3 }
 0x2d1   :  { %821 = vmatpush3.msra.mxu1 %v886_v25 }
 0x2d2   :  { %823 = vmatmul.mubr.msk.f32.vlgmr.msra.gmra.mxu1 %vm278_vm0, %v443_v24  ;;  %825 = vmatprep.subr.mxu1 %v1066_v3 }
 0x2d3   :  { %826 = vmatpush3.xpose.msk.msra.mxu1 %vm278_vm0, %v443_v24  ;;  %827 = vmatprep.mubr.msk.f32.mxu1 %vm1067_vm2, %v1066_v3 }
 0x37f   :  { %v1171_v26 = vpop.f32.mrf.mxu0 }
 0x380   :  { %v676_v37 = vsel %vm592_vm3, %v1171_v26, -inf }
 0x381   :  { %v834_v27 = vpop.f32.mrf.mxu0 }
 0x383   :  { %v653_v28 = vpop.f32.mrf.mxu0 }
 0x384   :  { %v757_v28 = vld [vmem:[#allocation2] ss:$0 sm:$0xff] }
 0x385   :  { %v835_v29 = vpop.f32.mrf.mxu0 }
 0x392   :  { %v513_v30 = vpop.f32.mrf.mxu1 }
 0x393   :  { %828 = vmatmul.mubr.msk.f32.vlgmr.msra.gmra.mxu1 %vm278_vm0, %v513_v30 }
 0x394   :  { %v824_v31 = vpop.f32.mrf.mxu1 }
 0x453   :  { %v586_v33 = vpop.f32.mrf.mxu1 }
 0x454   :  { %v591_v34 = vmul.f32 %v590_v32, %v586_v33  ;;  %v658_v39 = vmul.f32 0.015625, %v586_v33 }
 0x455   :  { %v829_v35 = vpop.f32.mrf.mxu1 }
 0x456   :  { %v593_v36 = vsel %vm592_vm3, %v591_v34, 0.0  ;;  %v660_v44 = vmul.f32 %v659_v40, %v658_v39 }
 0x457   :  { %594 = vadd.xlane.f32.xlu1 %v593_v36 }
 0x45b   :  { %677 = vmax.xlane.f32.xlu1 %v676_v37 }
 0x4e0   :  { %v595_v38 = vpop.xlane.xlu1 %594 }
 0x4e1   :  { %887 = vlog2.f32 %v595_v38  ;;  %v762_v41 = vadd.f32 -59.11245, %v595_v38 }
 0x4e3   :  { %v657_v42 = vmul.f32 0.017857144, %v762_v41 }
 0x4e4   :  { %v678_v43 = vpop.xlane.xlu1 %677 }
 0x4e5   :  { %v661_v45 = vmul.f32 %v657_v42, %v590_v32  ;;  %v679_v46 = vsub.f32 %v1171_v26, %v678_v43 }
 0x4e7   :  { %v680_v47 = vmul.f32 1.442695, %v679_v46  ;;  %v662_v48 = vadd.f32 %v661_v45, %v660_v44 }
 0x4e9   :  { %889 = vpow2.f32 %v680_v47  ;;  %v663_v49 = vmul.f32 %v662_v48, %v662_v48 }
 0x4eb   :  { %v664_v50 = vsel %vm592_vm3, %v663_v49, 0.0 }
 0x4ec   :  { %665 = vadd.xlane.f32.xlu0 %v664_v50 }
 0x4ee   :  { %v888_v51 = vpop.eup %887 }
 0x4ef   :  { %v597_v52 = vmul.f32 0.6931472, %v888_v51 }
 0x4f1   :  { %v761_v53 = vadd.f32 -4.0794415, %v597_v52 }
 0x4f3   :  { %v600_v54 = vsel %vm599_vm1, %v761_v53, 0.0 }
 0x4f4   :  { %v601_v55 = vrot.slane %v600_v54, 4 }
 0x4f6   :  { %v890_v56 = vpop.eup %889  ;;  %v602_v57 = vadd.f32 %v601_v55, %v600_v54 }
 0x4f7   :  { %v682_v58 = vsel %vm592_vm3, %v890_v56, 0.0 }
 0x4f8   :  { %v603_v59 = vrot.slane %v602_v57, 2  ;;  %683 = vadd.xlane.f32.xlu1 %v682_v58 }
 0x4fa   :  { %v604_v60 = vadd.f32 %v603_v59, %v602_v57 }
 0x4fc   :  { %323 = vadd.xlane.f32.xlu1 %v1160_v61  ;;  %v605_v62 = vrot.slane %v604_v60, 1 }
 0x4fe   :  { %v606_v63 = vadd.f32 %v605_v62, %v604_v60 }
 0x500   :  { %v607_v0 = vmul.f32 0.25, %v606_v63 }
 0x502   :  { %718 = vst.msk [vmem:[#allocation14] sm:$0x1] %vm717_vm4, %v607_v0 }
 0x575   :  { %v666_v1 = vpop.xlane.xlu0 %665 }
 0x576   :  { %v667_v2 = vsel %vm599_vm1, %v666_v1, 0.0 }
 0x577   :  { %v668_v3 = vrot.slane %v667_v2, 4 }
 0x579   :  { %v669_v4 = vadd.f32 %v668_v3, %v667_v2 }
 0x57b   :  { %v670_v5 = vrot.slane %v669_v4, 2 }
 0x57d   :  { %v671_v6 = vadd.f32 %v670_v5, %v669_v4 }
 0x57f   :  { %v672_v7 = vrot.slane %v671_v6, 1 }
 0x581   :  { %v673_v8 = vadd.f32 %v672_v7, %v671_v6  ;;  %v684_v20 = vpop.xlane.xlu1 %683 }
 0x583   :  { %891 = vrsqrt.f32 %v673_v8 }
 0x585   :  { %v324_v27 = vpop.xlane.xlu1 %323 }
 0x590   :  { %v892_v9 = vpop.eup %891 }
 0x591   :  { %v675_v10 = vmul.f32 %v892_v9, %v662_v48 }
 0x593   :  { %v689_v11 = vsel %vm592_vm3, %v675_v10, -inf }
 0x594   :  { %690 = vmax.xlane.f32.xlu0 %v689_v11 }
 0x61d   :  { %v691_v61 = vpop.xlane.xlu0 %690 }
 0x61e   :  { %v692_v12 = vsub.f32 %v675_v10, %v691_v61 }
 0x620   :  { %v693_v13 = vmul.f32 1.442695, %v692_v12 }
 0x622   :  { %893 = vpow2.f32 %v693_v13 }
 0x623   :  { %895 = vlog2.f32 %v684_v20 }
 0x62f   :  { %v894_v17 = vpop.eup %893 }
 0x630   :  { %v695_v18 = vsel %vm592_vm3, %v894_v17, 0.0  ;;  %v896_v21 = vpop.eup %895 }
 0x631   :  { %696 = vadd.xlane.f32.xlu0 %v695_v18  ;;  %v686_v22 = vmul.f32 0.6931472, %v896_v21 }
 0x633   :  { %v687_v23 = vadd.f32 %v686_v22, %v678_v43 }
 0x635   :  { %337 = vadd.xlane.f32.xlu0 %v336_v19  ;;  %v688_v25 = vsub.f32 %v1171_v26, %v687_v23 }
 0x637   :  { %v702_v31 = vmul.f32 1.442695, %v688_v25 }
 0x6ba   :  { %v697_v24 = vpop.xlane.xlu0 %696 }
 0x6bb   :  { %897 = vlog2.f32 %v697_v24 }
 0x6bc   :  { %899 = vpow2.f32 %v702_v31 }
 0x6be   :  { %v338_v29 = vpop.xlane.xlu0 %337 }
 0x6bf   :  { %v339_v30 = vadd.f32 %v338_v29, %v324_v27 }
 0x6c1   :  { %v347_v32 = vadd.f32 %v757_v28, %v339_v30 }
 0x6c3   :  { %v348_v33 = vsub.f32 0.0, %v347_v32 }
 0x6c5   :  { %v349_v34 = vmul.f32 1.442695, %v348_v33 }
 0x6c7   :  { %901 = vpow2.f32 %v349_v34 }
 0x6c8   :  { %v898_v35 = vpop.eup %897 }
 0x6c9   :  { %v699_v36 = vmul.f32 0.6931472, %v898_v35  ;;  %v900_v40 = vpop.eup %899 }
 0x6cb   :  { %v700_v37 = vadd.f32 %v699_v36, %v691_v61 }
 0x6cd   :  { %v701_v38 = vsub.f32 %v675_v10, %v700_v37 }
 0x6cf   :  { %v704_v39 = vsub.f32 %v688_v25, %v701_v38 }
 0x6d1   :  { %v705_v41 = vmul.f32 %v900_v40, %v704_v39 }
 0x6d3   :  { %v706_v42 = vsel %vm592_vm3, %v705_v41, 0.0 }
 0x6d4   :  { %v902_v26 = vpop.eup %901  ;;  %707 = vadd.xlane.f32.xlu1 %v706_v42 }
 0x6d5   :  { %v351_v43 = vadd.f32 1.0, %v902_v26 }
 0x6d7   :  { %903 = vrcp.f32 %v351_v43 }
 0x6e4   :  { %v904_v44 = vpop.eup %903 }
 0x6e5   :  { %355 = vst.msk [vmem:[%s1210_s10] sm:$0xff] %vm354_vm6, %v904_v44 }
 0x75d   :  { %v708_v45 = vpop.xlane.xlu1 %707 }
 0x75e   :  { %v709_v46 = vsel %vm599_vm1, %v708_v45, 0.0 }
 0x75f   :  { %v710_v47 = vrot.slane %v709_v46, 4 }
 0x761   :  { %v711_v48 = vadd.f32 %v710_v47, %v709_v46 }
 0x763   :  { %v712_v49 = vrot.slane %v711_v48, 2 }
 0x765   :  { %v713_v50 = vadd.f32 %v712_v49, %v711_v48 }
 0x767   :  { %v714_v51 = vrot.slane %v713_v50, 1 }
 0x769   :  { %v715_v52 = vadd.f32 %v714_v51, %v713_v50 }
 0x76b   :  { %v716_v53 = vmul.f32 0.0625, %v715_v52 }
 0x76d   :  { %720 = vst.msk [vmem:[#allocation14] sm:$0x1] %vm719_vm7, %v716_v53 }
 0x76e   :  { %1036 = shalt.err (!%p1033_p6)
}
 0x76f   :  { %732 = dma.vmem_to_hbm [thread:$0]  %s730_s15, 16, %s1211_s11, [#allocation5]  }
 0x770   :  { %1053 = dma.done.wait [#allocation5], 16  }
 0x771   :  { %1054 = vsyncadd [#allocation5], 4294967280 }
 0x772   :  { %738 = vsyncpa [#allocation4], 1 }
 0x773   :  { %739 = vsyncpa [#allocation7], 1 }
 0x774   :  { %740 = vsyncpa [#allocation10], 1 }
 0x775   :  { %741 = vsyncpa [#allocation13], 1 }
 0x776   :  { %742 = vsyncpa [#allocation5], 1 }

</bundles_post_ra>
